<compile_context>
chip_gen: v7x
topology: tpu7x:2x2x1
jax: 0.10.0
libtpu: 0.0.40
codegen_flags: <defaults>
</compile_context>

<pallas_src>
import functools

import jax
import jax.numpy as jnp
from jax.experimental import pallas as pl
from jax.experimental.pallas import tpu as pltpu

EPS = 1e-5
# bf16 operands would ~2x MXU throughput and halve VMEM/HBM bytes, but quantizing the
# stage-1 hand-off risks the strict 1e-4 check (perf-review correctness concern #2),
# so the shipped kernel keeps f32 matmuls.
MXU_DTYPE = jnp.float32


def _double_conv_kernel(x_ref, shift_ref, w1_ref, w2_ref, p1_ref, p2_ref,
                        gred_ref, gbc_ref, out_ref, *, n, cout):
    """Fused (conv3x3 -> BN(train) -> ReLU) x 2 on a lane-dense (B*H, W*C) slab."""
    s_up = shift_ref[0]        # (B*H, B*H): picks the row above (0 at image-top rows)
    s_dn = shift_ref[1]        # (B*H, B*H): picks the row below (0 at image-bottom rows)
    g_reduce = gred_ref[...]   # (2*W*Cout, 2*Cout) block-diag per-channel reduce matrix
    g_bcast = gbc_ref[...]     # (Cout, W*Cout)     per-channel broadcast matrix

    def conv_bn_relu(src, w_ref, p_ref):
        # ---- 3x3 SAME conv as 3 accumulated MXU matmuls (one per vertical tap). ----
        # Horizontal taps + zero padding live in the banded weights; vertical taps are
        # row shifts of the unpadded activation via the precomputed shift matrices
        # (which also zero rows that would cross a batch-image boundary).
        acc = jnp.dot(src, w_ref[1], preferred_element_type=jnp.float32)
        up = jnp.dot(s_up, src, preferred_element_type=jnp.float32)
        acc = acc + jnp.dot(up, w_ref[0], preferred_element_type=jnp.float32)
        dn = jnp.dot(s_dn, src, preferred_element_type=jnp.float32)
        acc = acc + jnp.dot(dn, w_ref[2], preferred_element_type=jnp.float32)

        # ---- BatchNorm (training mode), single pass, ONE reduce matmul. ----
        ext = jnp.concatenate([acc, acc * acc], axis=1)            # (B*H, 2*W*Cout)
        row = jnp.sum(ext, axis=0, keepdims=True)                  # (1, 2*W*Cout)
        stats = jnp.dot(row, g_reduce,
                        preferred_element_type=jnp.float32)        # (1, 2*Cout)
        mean_c = stats[:, 0:cout] * (1.0 / n)
        var_c = stats[:, cout:2 * cout] * (1.0 / n) - mean_c * mean_c   # biased var
        # TODO(synk): single-pass variance can lose precision when |mean| >> std on
        # real data; switch to a shifted / two-pass scheme if tolerance slips.
        scale_c = jax.lax.rsqrt(var_c + EPS) * p_ref[0:1, :]       # gamma folded in
        shift_c = p_ref[1:2, :] - mean_c * scale_c                 # beta - mean*scale
        scale_row = jnp.dot(scale_c, g_bcast, preferred_element_type=jnp.float32)
        shift_row = jnp.dot(shift_c, g_bcast, preferred_element_type=jnp.float32)
        return jnp.maximum(acc * scale_row + shift_row, 0.0)       # BN affine + ReLU

    y1 = conv_bn_relu(x_ref[...], w1_ref, p1_ref)        # stage-1 result stays in vregs
    y2 = conv_bn_relu(y1, w2_ref, p2_ref)
    out_ref[...] = y2.astype(out_ref.dtype)               # (B*H, W*Cout), lane-dense


def _banded_weights(w_hwio, W):
    """HWIO (3,3,Ci,Co) -> (3, W*Ci, W*Co): per-vertical-tap banded matrices applying
    all three horizontal taps (with zero padding) of a 'same' 3x3 conv to one row."""
    KH, KW, Cin, Cout = w_hwio.shape
    xi = jnp.arange(W)
    xo = jnp.arange(W)
    kx = jnp.arange(KW)
    band = (xi[None, :, None] == xo[None, None, :] + kx[:, None, None] - 1)
    band = band.astype(w_hwio.dtype)                          # (KW, W, W)
    big = jnp.einsum('kio,hkcd->hicod', band, w_hwio)         # (KH, W, Cin, W, Cout)
    # TODO(synk): quadratic in W and ~2/3 structural zeros; tile W (or shift-and-
    # accumulate over kx) before scaling this to real U-Net widths / v7x 64 MiB VMEM.
    return big.reshape(KH, W * Cin, W * Cout)


def _row_shift_matrices(B, H, dtype):
    """(2, B*H, B*H): [0] selects the row above, [1] the row below; zero across image
    (batch) boundaries, i.e. vertical zero-padding is built in."""
    r = jnp.arange(B * H)
    up = (r[None, :] == r[:, None] - 1) & (r[:, None] % H != 0)
    dn = (r[None, :] == r[:, None] + 1) & (r[:, None] % H != H - 1)
    return jnp.stack([up, dn]).astype(dtype)


def _bn_matrices(W, Cout):
    """Block-diag reduce matrix (2*W*Cout, 2*Cout) for fused [sum|sumsq] per channel,
    and broadcast matrix (Cout, W*Cout) back to the interleaved lane layout."""
    WC = W * Cout
    lane2 = jnp.arange(2 * WC)
    ch2 = jnp.arange(2 * Cout)
    g_reduce = ((lane2[:, None] % Cout == ch2[None, :] % Cout)
                & (lane2[:, None] // WC == ch2[None, :] // Cout))
    lane = jnp.arange(WC)
    ch = jnp.arange(Cout)
    g_bcast = (ch[:, None] == lane[None, :] % Cout)
    return g_reduce.astype(jnp.float32), g_bcast.astype(jnp.float32)


def double_conv_forward(x_nchw, params):
    """Equivalent of inconv(in_ch, out_ch).forward(x) with x in NCHW (PyTorch layout)."""
    B, Cin, H, W = x_nchw.shape
    Cout = params["w1"].shape[-1]
    BH = B * H

    # NCHW -> NHWC -> lane-dense 2-D (B*H, W*Cin).  Pure layout plumbing in XLA.
    x2d = jnp.transpose(x_nchw, (0, 2, 3, 1)).reshape(BH, W * Cin).astype(MXU_DTYPE)

    w1 = _banded_weights(params["w1"], W).astype(MXU_DTYPE)     # (3, W*Cin,  W*Cout)
    w2 = _banded_weights(params["w2"], W).astype(MXU_DTYPE)     # (3, W*Cout, W*Cout)
    shifts = _row_shift_matrices(B, H, MXU_DTYPE)               # (2, B*H, B*H)
    g_reduce, g_bcast = _bn_matrices(W, Cout)
    p1 = jnp.stack([params["g1"], params["be1"]]).astype(jnp.float32)   # (2, Cout)
    p2 = jnp.stack([params["g2"], params["be2"]]).astype(jnp.float32)
    # NOTE: conv biases b1/b2 intentionally NOT passed: training-mode BN subtracts the
    # per-channel batch mean right after each conv, which cancels them exactly.

    kernel = functools.partial(_double_conv_kernel, n=float(B * H * W), cout=Cout)
    vmem = pl.BlockSpec(memory_space=pltpu.MemorySpace.VMEM)
    out2d = pl.pallas_call(
        kernel,
        out_shape=jax.ShapeDtypeStruct((BH, W * Cout), jnp.float32),
        in_specs=[vmem] * 8,
        out_specs=vmem,
        # TODO(synk): for real U-Net sizes, add a "parallel" batch/row-block grid (uses
        # v7x's second TensorCore and fills the 256x256 MXU) with a cross-tile
        # sum/sumsq accumulator or two-pass scheme so training-mode BN stays global,
        # sizing tiles against v7x's 64 MiB VMEM.
    )(x2d, shifts, w1, w2, p1, p2, g_reduce, g_bcast)

    # (B*H, W*Cout) -> NHWC -> NCHW.
    return jnp.transpose(out2d.reshape(B, H, W, Cout), (0, 3, 1, 2))


# ----------------------- pure-JAX reference (for checking) ----------------------- #
def _ref_stage(x, w, b, g, be):
    y = jax.lax.conv_general_dilated(
        x, w, window_strides=(1, 1), padding="SAME",
        dimension_numbers=("NHWC", "HWIO", "NHWC"))
    y = y + b.reshape(1, 1, 1, -1)
    mean = jnp.mean(y, axis=(0, 1, 2), keepdims=True)
    var = jnp.mean((y - mean) ** 2, axis=(0, 1, 2), keepdims=True)
    y = (y - mean) * jax.lax.rsqrt(var + EPS)
    y = y * g.reshape(1, 1, 1, -1) + be.reshape(1, 1, 1, -1)
    return jnp.maximum(y, 0.0)


def ref_forward(x_nchw, params):
    x = jnp.transpose(x_nchw, (0, 2, 3, 1))
    x = _ref_stage(x, params["w1"], params["b1"], params["g1"], params["be1"])
    x = _ref_stage(x, params["w2"], params["b2"], params["g2"], params["be2"])
    return jnp.transpose(x, (0, 3, 1, 2))


if __name__ == "__main__":
    B, IN_CH, OUT_CH, H, W = 2, 4, 8, 16, 16

    key = jax.random.PRNGKey(0)
    ks = jax.random.split(key, 9)

    # Deterministic synthetic parameters (Conv2d weights kept as HWIO).
    params = {
        "w1": 0.1 * jax.random.normal(ks[0], (3, 3, IN_CH, OUT_CH), jnp.float32),
        "b1": 0.1 * jax.random.normal(ks[1], (OUT_CH,), jnp.float32),
        "g1": 1.0 + 0.1 * jax.random.normal(ks[2], (OUT_CH,), jnp.float32),
        "be1": 0.1 * jax.random.normal(ks[3], (OUT_CH,), jnp.float32),
        "w2": 0.1 * jax.random.normal(ks[4], (3, 3, OUT_CH, OUT_CH), jnp.float32),
        "b2": 0.1 * jax.random.normal(ks[5], (OUT_CH,), jnp.float32),
        "g2": 1.0 + 0.1 * jax.random.normal(ks[6], (OUT_CH,), jnp.float32),
        "be2": 0.1 * jax.random.normal(ks[7], (OUT_CH,), jnp.float32),
    }

    x = jax.random.normal(ks[8], (B, IN_CH, H, W), jnp.float32)   # NCHW, like PyTorch

    out = jax.block_until_ready(double_conv_forward(x, params))
    ref = jax.block_until_ready(ref_forward(x, params))

    assert out.shape == (B, OUT_CH, H, W), out.shape
    max_err = float(jnp.max(jnp.abs(out - ref)))
    assert jnp.allclose(out, ref, atol=1e-4, rtol=1e-4), max_err

    print("KERNEL_OK")
</pallas_src>

<mosaic_0001>
module attributes {stable_mosaic.version = 11 : i64} {
  func.func @_double_conv_kernel(%arg0: memref<32x64xf32, #tpu.memory_space<vmem>>, %arg1: memref<2x32x32xf32, #tpu.memory_space<vmem>>, %arg2: memref<3x64x128xf32, #tpu.memory_space<vmem>>, %arg3: memref<3x128x128xf32, #tpu.memory_space<vmem>>, %arg4: memref<2x8xf32, #tpu.memory_space<vmem>>, %arg5: memref<2x8xf32, #tpu.memory_space<vmem>>, %arg6: memref<256x16xf32, #tpu.memory_space<vmem>>, %arg7: memref<8x128xf32, #tpu.memory_space<vmem>>, %arg8: memref<32x128xf32, #tpu.memory_space<vmem>>) attributes {dimension_semantics = [], scalar_prefetch = 0 : i64, scratch_operands = 0 : i64, tpu.core_type = #tpu.core_type<tc>} {
    %c0 = arith.constant 0 : index
    %c0_0 = arith.constant 0 : index
    %c0_1 = arith.constant 0 : index
    %0 = vector.load %arg1[%c0, %c0_0, %c0_1] : memref<2x32x32xf32, #tpu.memory_space<vmem>>, vector<1x32x32xf32>
    %1 = vector.shape_cast %0 : vector<1x32x32xf32> to vector<32x32xf32>
    %c1 = arith.constant 1 : index
    %c0_2 = arith.constant 0 : index
    %c0_3 = arith.constant 0 : index
    %2 = vector.load %arg1[%c1, %c0_2, %c0_3] : memref<2x32x32xf32, #tpu.memory_space<vmem>>, vector<1x32x32xf32>
    %3 = vector.shape_cast %2 : vector<1x32x32xf32> to vector<32x32xf32>
    %c0_4 = arith.constant 0 : index
    %c0_5 = arith.constant 0 : index
    %4 = vector.load %arg6[%c0_4, %c0_5] : memref<256x16xf32, #tpu.memory_space<vmem>>, vector<256x16xf32>
    %c0_6 = arith.constant 0 : index
    %c0_7 = arith.constant 0 : index
    %5 = vector.load %arg7[%c0_6, %c0_7] : memref<8x128xf32, #tpu.memory_space<vmem>>, vector<8x128xf32>
    %c0_8 = arith.constant 0 : index
    %c0_9 = arith.constant 0 : index
    %6 = vector.load %arg0[%c0_8, %c0_9] : memref<32x64xf32, #tpu.memory_space<vmem>>, vector<32x64xf32>
    %c1_10 = arith.constant 1 : index
    %c0_11 = arith.constant 0 : index
    %c0_12 = arith.constant 0 : index
    %7 = vector.load %arg2[%c1_10, %c0_11, %c0_12] : memref<3x64x128xf32, #tpu.memory_space<vmem>>, vector<1x64x128xf32>
    %8 = vector.shape_cast %7 : vector<1x64x128xf32> to vector<64x128xf32>
    %cst = arith.constant dense<0.000000e+00> : vector<32x128xf32>
    %9 = tpu.matmul %6, %8, %cst {dimension_numbers = #tpu.dot_dimension_numbers<[1], [0], [0], [1], [0, 0, 1, 1], [], []>} : vector<32x64xf32>, vector<64x128xf32>, vector<32x128xf32> -> vector<32x128xf32>
    %cst_13 = arith.constant dense<0.000000e+00> : vector<32x64xf32>
    %10 = tpu.matmul %1, %6, %cst_13 {dimension_numbers = #tpu.dot_dimension_numbers<[1], [0], [0], [1], [0, 0, 1, 1], [], []>} : vector<32x32xf32>, vector<32x64xf32>, vector<32x64xf32> -> vector<32x64xf32>
    %c0_14 = arith.constant 0 : index
    %c0_15 = arith.constant 0 : index
    %c0_16 = arith.constant 0 : index
    %11 = vector.load %arg2[%c0_14, %c0_15, %c0_16] : memref<3x64x128xf32, #tpu.memory_space<vmem>>, vector<1x64x128xf32>
    %12 = vector.shape_cast %11 : vector<1x64x128xf32> to vector<64x128xf32>
    %cst_17 = arith.constant dense<0.000000e+00> : vector<32x128xf32>
    %13 = tpu.matmul %10, %12, %cst_17 {dimension_numbers = #tpu.dot_dimension_numbers<[1], [0], [0], [1], [0, 0, 1, 1], [], []>} : vector<32x64xf32>, vector<64x128xf32>, vector<32x128xf32> -> vector<32x128xf32>
    %14 = arith.addf %9, %13 : vector<32x128xf32>
    %cst_18 = arith.constant dense<0.000000e+00> : vector<32x64xf32>
    %15 = tpu.matmul %3, %6, %cst_18 {dimension_numbers = #tpu.dot_dimension_numbers<[1], [0], [0], [1], [0, 0, 1, 1], [], []>} : vector<32x32xf32>, vector<32x64xf32>, vector<32x64xf32> -> vector<32x64xf32>
    %c2 = arith.constant 2 : index
    %c0_19 = arith.constant 0 : index
    %c0_20 = arith.constant 0 : index
    %16 = vector.load %arg2[%c2, %c0_19, %c0_20] : memref<3x64x128xf32, #tpu.memory_space<vmem>>, vector<1x64x128xf32>
    %17 = vector.shape_cast %16 : vector<1x64x128xf32> to vector<64x128xf32>
    %cst_21 = arith.constant dense<0.000000e+00> : vector<32x128xf32>
    %18 = tpu.matmul %15, %17, %cst_21 {dimension_numbers = #tpu.dot_dimension_numbers<[1], [0], [0], [1], [0, 0, 1, 1], [], []>} : vector<32x64xf32>, vector<64x128xf32>, vector<32x128xf32> -> vector<32x128xf32>
    %19 = arith.addf %14, %18 : vector<32x128xf32>
    %20 = arith.mulf %19, %19 : vector<32x128xf32>
    %21 = tpu.concatenate %19, %20 in 1 : vector<32x128xf32>, vector<32x128xf32> -> vector<32x256xf32>
    %cst_22 = arith.constant dense<0.000000e+00> : vector<256xf32>
    %22 = vector.multi_reduction <add>, %21, %cst_22 [0] : vector<32x256xf32> to vector<256xf32>
    %23 = vector.shape_cast %22 : vector<256xf32> to vector<1x256xf32>
    %cst_23 = arith.constant dense<0.000000e+00> : vector<1x16xf32>
    %24 = tpu.matmul %23, %4, %cst_23 {dimension_numbers = #tpu.dot_dimension_numbers<[1], [0], [0], [1], [0, 0, 1, 1], [], []>} : vector<1x256xf32>, vector<256x16xf32>, vector<1x16xf32> -> vector<1x16xf32>
    %25 = vector.extract_strided_slice %24 {offsets = [0, 0], sizes = [1, 8], strides = [1, 1]} : vector<1x16xf32> to vector<1x8xf32>
    %cst_24 = arith.constant 0.001953125 : f32
    %26 = vector.broadcast %cst_24 : f32 to vector<1x8xf32>
    %27 = arith.mulf %25, %26 : vector<1x8xf32>
    %28 = vector.extract_strided_slice %24 {offsets = [0, 8], sizes = [1, 8], strides = [1, 1]} : vector<1x16xf32> to vector<1x8xf32>
    %cst_25 = arith.constant 0.001953125 : f32
    %29 = vector.broadcast %cst_25 : f32 to vector<1x8xf32>
    %30 = arith.mulf %28, %29 : vector<1x8xf32>
    %31 = arith.mulf %27, %27 : vector<1x8xf32>
    %32 = arith.subf %30, %31 : vector<1x8xf32>
    %cst_26 = arith.constant 9.99999974E-6 : f32
    %33 = vector.broadcast %cst_26 : f32 to vector<1x8xf32>
    %34 = arith.addf %32, %33 : vector<1x8xf32>
    %35 = math.rsqrt %34 : vector<1x8xf32>
    %c0_27 = arith.constant 0 : index
    %c0_28 = arith.constant 0 : index
    %36 = vector.load %arg4[%c0_27, %c0_28] : memref<2x8xf32, #tpu.memory_space<vmem>>, vector<1x8xf32>
    %37 = arith.mulf %35, %36 : vector<1x8xf32>
    %c1_29 = arith.constant 1 : index
    %c0_30 = arith.constant 0 : index
    %38 = vector.load %arg4[%c1_29, %c0_30] : memref<2x8xf32, #tpu.memory_space<vmem>>, vector<1x8xf32>
    %39 = arith.mulf %27, %37 : vector<1x8xf32>
    %40 = arith.subf %38, %39 : vector<1x8xf32>
    %cst_31 = arith.constant dense<0.000000e+00> : vector<1x128xf32>
    %41 = tpu.matmul %37, %5, %cst_31 {dimension_numbers = #tpu.dot_dimension_numbers<[1], [0], [0], [1], [0, 0, 1, 1], [], []>} : vector<1x8xf32>, vector<8x128xf32>, vector<1x128xf32> -> vector<1x128xf32>
    %cst_32 = arith.constant dense<0.000000e+00> : vector<1x128xf32>
    %42 = tpu.matmul %40, %5, %cst_32 {dimension_numbers = #tpu.dot_dimension_numbers<[1], [0], [0], [1], [0, 0, 1, 1], [], []>} : vector<1x8xf32>, vector<8x128xf32>, vector<1x128xf32> -> vector<1x128xf32>
    %43 = vector.broadcast %41 : vector<1x128xf32> to vector<32x128xf32>
    %44 = arith.mulf %19, %43 : vector<32x128xf32>
    %45 = vector.broadcast %42 : vector<1x128xf32> to vector<32x128xf32>
    %46 = arith.addf %44, %45 : vector<32x128xf32>
    %cst_33 = arith.constant 0.000000e+00 : f32
    %47 = vector.broadcast %cst_33 : f32 to vector<32x128xf32>
    %48 = arith.maximumf %46, %47 : vector<32x128xf32>
    %c1_34 = arith.constant 1 : index
    %c0_35 = arith.constant 0 : index
    %c0_36 = arith.constant 0 : index
    %49 = vector.load %arg3[%c1_34, %c0_35, %c0_36] : memref<3x128x128xf32, #tpu.memory_space<vmem>>, vector<1x128x128xf32>
    %50 = vector.shape_cast %49 : vector<1x128x128xf32> to vector<128x128xf32>
    %cst_37 = arith.constant dense<0.000000e+00> : vector<32x128xf32>
    %51 = tpu.matmul %48, %50, %cst_37 {dimension_numbers = #tpu.dot_dimension_numbers<[1], [0], [0], [1], [0, 0, 1, 1], [], []>} : vector<32x128xf32>, vector<128x128xf32>, vector<32x128xf32> -> vector<32x128xf32>
    %cst_38 = arith.constant dense<0.000000e+00> : vector<32x128xf32>
    %52 = tpu.matmul %1, %48, %cst_38 {dimension_numbers = #tpu.dot_dimension_numbers<[1], [0], [0], [1], [0, 0, 1, 1], [], []>} : vector<32x32xf32>, vector<32x128xf32>, vector<32x128xf32> -> vector<32x128xf32>
    %c0_39 = arith.constant 0 : index
    %c0_40 = arith.constant 0 : index
    %c0_41 = arith.constant 0 : index
    %53 = vector.load %arg3[%c0_39, %c0_40, %c0_41] : memref<3x128x128xf32, #tpu.memory_space<vmem>>, vector<1x128x128xf32>
    %54 = vector.shape_cast %53 : vector<1x128x128xf32> to vector<128x128xf32>
    %cst_42 = arith.constant dense<0.000000e+00> : vector<32x128xf32>
    %55 = tpu.matmul %52, %54, %cst_42 {dimension_numbers = #tpu.dot_dimension_numbers<[1], [0], [0], [1], [0, 0, 1, 1], [], []>} : vector<32x128xf32>, vector<128x128xf32>, vector<32x128xf32> -> vector<32x128xf32>
    %56 = arith.addf %51, %55 : vector<32x128xf32>
    %cst_43 = arith.constant dense<0.000000e+00> : vector<32x128xf32>
    %57 = tpu.matmul %3, %48, %cst_43 {dimension_numbers = #tpu.dot_dimension_numbers<[1], [0], [0], [1], [0, 0, 1, 1], [], []>} : vector<32x32xf32>, vector<32x128xf32>, vector<32x128xf32> -> vector<32x128xf32>
    %c2_44 = arith.constant 2 : index
    %c0_45 = arith.constant 0 : index
    %c0_46 = arith.constant 0 : index
    %58 = vector.load %arg3[%c2_44, %c0_45, %c0_46] : memref<3x128x128xf32, #tpu.memory_space<vmem>>, vector<1x128x128xf32>
    %59 = vector.shape_cast %58 : vector<1x128x128xf32> to vector<128x128xf32>
    %cst_47 = arith.constant dense<0.000000e+00> : vector<32x128xf32>
    %60 = tpu.matmul %57, %59, %cst_47 {dimension_numbers = #tpu.dot_dimension_numbers<[1], [0], [0], [1], [0, 0, 1, 1], [], []>} : vector<32x128xf32>, vector<128x128xf32>, vector<32x128xf32> -> vector<32x128xf32>
    %61 = arith.addf %56, %60 : vector<32x128xf32>
    %62 = arith.mulf %61, %61 : vector<32x128xf32>
    %63 = tpu.concatenate %61, %62 in 1 : vector<32x128xf32>, vector<32x128xf32> -> vector<32x256xf32>
    %cst_48 = arith.constant dense<0.000000e+00> : vector<256xf32>
    %64 = vector.multi_reduction <add>, %63, %cst_48 [0] : vector<32x256xf32> to vector<256xf32>
    %65 = vector.shape_cast %64 : vector<256xf32> to vector<1x256xf32>
    %cst_49 = arith.constant dense<0.000000e+00> : vector<1x16xf32>
    %66 = tpu.matmul %65, %4, %cst_49 {dimension_numbers = #tpu.dot_dimension_numbers<[1], [0], [0], [1], [0, 0, 1, 1], [], []>} : vector<1x256xf32>, vector<256x16xf32>, vector<1x16xf32> -> vector<1x16xf32>
    %67 = vector.extract_strided_slice %66 {offsets = [0, 0], sizes = [1, 8], strides = [1, 1]} : vector<1x16xf32> to vector<1x8xf32>
    %cst_50 = arith.constant 0.001953125 : f32
    %68 = vector.broadcast %cst_50 : f32 to vector<1x8xf32>
    %69 = arith.mulf %67, %68 : vector<1x8xf32>
    %70 = vector.extract_strided_slice %66 {offsets = [0, 8], sizes = [1, 8], strides = [1, 1]} : vector<1x16xf32> to vector<1x8xf32>
    %cst_51 = arith.constant 0.001953125 : f32
    %71 = vector.broadcast %cst_51 : f32 to vector<1x8xf32>
    %72 = arith.mulf %70, %71 : vector<1x8xf32>
    %73 = arith.mulf %69, %69 : vector<1x8xf32>
    %74 = arith.subf %72, %73 : vector<1x8xf32>
    %cst_52 = arith.constant 9.99999974E-6 : f32
    %75 = vector.broadcast %cst_52 : f32 to vector<1x8xf32>
    %76 = arith.addf %74, %75 : vector<1x8xf32>
    %77 = math.rsqrt %76 : vector<1x8xf32>
    %c0_53 = arith.constant 0 : index
    %c0_54 = arith.constant 0 : index
    %78 = vector.load %arg5[%c0_53, %c0_54] : memref<2x8xf32, #tpu.memory_space<vmem>>, vector<1x8xf32>
    %79 = arith.mulf %77, %78 : vector<1x8xf32>
    %c1_55 = arith.constant 1 : index
    %c0_56 = arith.constant 0 : index
    %80 = vector.load %arg5[%c1_55, %c0_56] : memref<2x8xf32, #tpu.memory_space<vmem>>, vector<1x8xf32>
    %81 = arith.mulf %69, %79 : vector<1x8xf32>
    %82 = arith.subf %80, %81 : vector<1x8xf32>
    %cst_57 = arith.constant dense<0.000000e+00> : vector<1x128xf32>
    %83 = tpu.matmul %79, %5, %cst_57 {dimension_numbers = #tpu.dot_dimension_numbers<[1], [0], [0], [1], [0, 0, 1, 1], [], []>} : vector<1x8xf32>, vector<8x128xf32>, vector<1x128xf32> -> vector<1x128xf32>
    %cst_58 = arith.constant dense<0.000000e+00> : vector<1x128xf32>
    %84 = tpu.matmul %82, %5, %cst_58 {dimension_numbers = #tpu.dot_dimension_numbers<[1], [0], [0], [1], [0, 0, 1, 1], [], []>} : vector<1x8xf32>, vector<8x128xf32>, vector<1x128xf32> -> vector<1x128xf32>
    %85 = vector.broadcast %83 : vector<1x128xf32> to vector<32x128xf32>
    %86 = arith.mulf %61, %85 : vector<32x128xf32>
    %87 = vector.broadcast %84 : vector<1x128xf32> to vector<32x128xf32>
    %88 = arith.addf %86, %87 : vector<32x128xf32>
    %cst_59 = arith.constant 0.000000e+00 : f32
    %89 = vector.broadcast %cst_59 : f32 to vector<32x128xf32>
    %90 = arith.maximumf %88, %89 : vector<32x128xf32>
    %c0_60 = arith.constant 0 : index
    %c0_61 = arith.constant 0 : index
    %91 = vector.load %arg8[%c0_60, %c0_61] : memref<32x128xf32, #tpu.memory_space<vmem>>, vector<32x128xf32>
    tpu.vector_store %arg8[%c0_60, %c0_61], %90 {strides = array<i32>} : memref<32x128xf32, #tpu.memory_space<vmem>>, vector<32x128xf32>,
    return
  }
}

</mosaic_0001>

<bundles_post_ra>
// kernel: tpu_custom_call.1
= control target key start
LH: loop header
LB: loop body
LE: loop exit
PB: predicated region body
PF: predicated region fallthrough
CT: control target
= control target key end

     0   :  { %13 = vsyncpa [#allocation3], 0  ;;  %s3027_s0 = inlined_call_operand.vmem [shape: f32[32,64], index: 0, kind: input, shape index: {}]   ;;  %s3028_s1 = inlined_call_operand.vmem [shape: f32[2,32,32], index: 1, kind: input, shape index: {}]   ;;  %s3029_s2 = inlined_call_operand.vmem [shape: f32[3,64,128], index: 2, kind: input, shape index: {}]   ;;  %s3030_s3 = inlined_call_operand.hbm [shape: f32[3,128,128], index: 3, kind: input, shape index: {}]   ;;  %s3031_s4 = inlined_call_operand.vmem [shape: f32[2,8], index: 4, kind: input, shape index: {}]   ;;  %s3032_s5 = inlined_call_operand.vmem [shape: f32[2,8], index: 5, kind: input, shape index: {}]   ;;  %s3033_s6 = inlined_call_operand.vmem [shape: f32[256,16], index: 6, kind: input, shape index: {}]   ;;  %s3034_s7 = inlined_call_operand.vmem [shape: f32[8,128], index: 7, kind: input, shape index: {}]   ;;  %s3035_s8 = inlined_call_operand.hbm [shape: f32[32,128], index: 8, kind: output, shape index: {}]  }
   0x1   :  { %14 = vsyncpa [#allocation4], 0  ;;  %s2495_s27 = smov [#allocation2]   ;;  %s2447_s9 = scalar_lea.hbm %s3030_s3, 6144 }
   0x2   :  { %s26_s28 = sshll.u32 %s2495_s27, 4  ;;  %p2448_p0 = scmp.ne.s32.totalorder %s3030_s3, %s2447_s9  ;;  %s27_s28 = int_to_ptr.vmem [resolvable:$true] %s26_s28 }
   0x3   :  { %p2451_p1 = scmp.lt.u32.totalorder %s2447_s9, %s3030_s3 }
   0x5   :  { %p2453_p2 = pnand %p2451_p1, %p2448_p0 }
   0x7   :  { %2456 = shalt.err (!%p2453_p2)
}
   0x8   :  { %s2457_s14 = scalar_lea.vmem %s27_s28, 6144  ;;  %p2462_p4 = scmp.lt.s32.totalorder %s27_s28, %s27_s28 }
   0x9   :  { %p2458_p3 = scmp.ne.s32.totalorder %s27_s28, %s2457_s14  ;;  %p2463_p5 = scmp.lt.s32.totalorder %s2457_s14, %s2457_s14 }
   0xb   :  { %p2464_p6 = por %p2463_p5, %p2462_p4 }
   0xd   :  { %p2465_p7 = pnand %p2464_p6, %p2458_p3 }
   0xf   :  { %2468 = shalt.err (!%p2465_p7)
}
  0x10   :  { %s2496_s15 = smov 128   ;;  %s2497_s16 = smov 8  }
  0x11   :  { %32 = dma.hbm_to_vmem [thread:$0]  %s3030_s3, 6144, %s27_s28, [#allocation3], %s2496_s15, %s2496_s15, %s2497_s16  }
  0x12   :  { %2491 = dma.done.wait [#allocation3], 6144  }
  0x13   :  { %2492 = vsyncadd [#allocation3], 4294961152  ;;  %vm99_vm0 = vcmask 261120   ;;  %v2565_v0 = vld [vmem:[%s3027_s0] sm:$0xff]  ;;  %v2570_v1 = vld [vmem:[%s3027_s0 + $0x8] sm:$0xff]  ;;  %vm205_vm1 = vcmask 523264  }
  0x14   :  { %v2575_v2 = vld [vmem:[%s3027_s0 + $0x10] sm:$0xff]  ;;  %v2180_v3 = vpack.c.bf16 %v2570_v1, %v2565_v0  ;;  %v2582_v4 = vld [vmem:[%s3027_s0 + $0x18] sm:$0xff]  ;;  %v2587_v5 = vld [vmem:[%s3028_s1] sm:$0xff]  ;;  %vm2499_vm2 = vmmov 0   ;;  %vm721_vm3 = vcmask 64512  }
  0x15   :  { %v2184_v6 = vpack.c.bf16 %v2582_v4, %v2575_v2  ;;  %1932 = vmatprep.mubr.msk.f32.mxu0 %vm99_vm0, %v2587_v5  ;;  %v197_v7 = vld [vmem:[%s3029_s2] sm:$0xff]  ;;  %v198_v8 = vld [vmem:[%s3029_s2 + $0x8] sm:$0xff]  ;;  %v199_v9 = vld [vmem:[%s3029_s2 + $0x10] sm:$0xff] }
  0x16   :  { %2181 = vmatprep.subr.bf16.mxu0 %v2180_v3  ;;  %v2188_v10 = vpack.c.bf16 %v198_v8, %v197_v7  ;;  %v200_v11 = vld [vmem:[%s3029_s2 + $0x18] sm:$0xff]  ;;  %v201_v13 = vld [vmem:[%s3029_s2 + $0x20] sm:$0xff]  ;;  %v202_v14 = vld [vmem:[%s3029_s2 + $0x28] sm:$0xff] }
  0x17   :  { %2183 = vmatpush3.bf16.msra.mxu0 %v2180_v3  ;;  %v2192_v12 = vpack.c.bf16 %v200_v11, %v199_v9  ;;  %v2614_v15 = vld [vmem:[%s3028_s1 + $0x8] sm:$0xff]  ;;  %v2619_v16 = vld [vmem:[%s3028_s1 + $0x10] sm:$0xff]  ;;  %v2196_v17 = vpack.c.bf16 %v202_v14, %v201_v13  ;;  %v204_v19 = vld [vmem:[%s3029_s2 + $0x38] sm:$0xff] }
  0x18   :  { %2185 = vmatprep.subr.bf16.mxu0 %v2184_v6  ;;  %2189 = vmatprep.subr.bf16.mxu1 %v2188_v10  ;;  %v203_v18 = vld [vmem:[%s3029_s2 + $0x30] sm:$0xff]  ;;  %v2634_v20 = vld [vmem:[%s3028_s1 + $0x18] sm:$0xff]  ;;  %v2639_v21 = vld [vmem:[%s3028_s1 + $0x20] sm:$0xff] }
  0x19   :  { %2191 = vmatpush3.bf16.msra.mxu1 %v2188_v10  ;;  %v2200_v22 = vpack.c.bf16 %v204_v19, %v203_v18  ;;  %v2648_v23 = vld [vmem:[%s3028_s1 + $0x28] sm:$0xff]  ;;  %v2653_v24 = vld [vmem:[%s3028_s1 + $0x30] sm:$0xff]  ;;  %v2662_v25 = vld [vmem:[%s3028_s1 + $0x38] sm:$0xff] }
  0x1a   :  { %2193 = vmatprep.subr.bf16.mxu1 %v2192_v12  ;;  %v1670_v26 = vld [vmem:[%s3029_s2 + $0x40] sm:$0xff]  ;;  %v1671_v27 = vld [vmem:[%s3029_s2 + $0x48] sm:$0xff]  ;;  %v1672_v29 = vld [vmem:[%s3029_s2 + $0x50] sm:$0xff] }
  0x1b   :  { %2187 = vmatpush3.bf16.msra.mxu0 %v2184_v6  ;;  %v2204_v28 = vpack.c.bf16 %v1671_v27, %v1670_v26  ;;  %v1673_v30 = vld [vmem:[%s3029_s2 + $0x58] sm:$0xff]  ;;  %v1674_v34 = vld [vmem:[%s3029_s2 + $0x60] sm:$0xff]  ;;  %v1675_v35 = vld [vmem:[%s3029_s2 + $0x68] sm:$0xff] }
  0x1c   :  { %2221 = vmatprep.subr.bf16.mxu0 %v2180_v3  ;;  %v2208_v33 = vpack.c.bf16 %v1673_v30, %v1672_v29  ;;  %v2212_v37 = vpack.c.bf16 %v1675_v35, %v1674_v34  ;;  %v1676_v39 = vld [vmem:[%s3029_s2 + $0x70] sm:$0xff]  ;;  %v1677_v40 = vld [vmem:[%s3029_s2 + $0x78] sm:$0xff]  ;;  %v1694_v44 = vld [vmem:[%s3029_s2 + $0x80] sm:$0xff] }
  0x1d   :  { %2195 = vmatpush3.bf16.msra.mxu1 %v2192_v12  ;;  %v2216_v42 = vpack.c.bf16 %v1677_v40, %v1676_v39  ;;  %v1695_v45 = vld [vmem:[%s3029_s2 + $0x88] sm:$0xff]  ;;  %v1696_v49 = vld [vmem:[%s3029_s2 + $0x90] sm:$0xff]  ;;  %v1697_v50 = vld [vmem:[%s3029_s2 + $0x98] sm:$0xff] }
  0x1e   :  { %1933 = vmatmul.mubr.msk.f32.vlgmr.msra.gmra.mrb[0].mxu0 %vm99_vm0, %v2614_v15  ;;  %2197 = vmatprep.subr.bf16.mxu1 %v2196_v17  ;;  %v2228_v47 = vpack.c.bf16 %v1695_v45, %v1694_v44  ;;  %v2232_v51 = vpack.c.bf16 %v1697_v50, %v1696_v49  ;;  %v1698_v52 = vld [vmem:[%s3029_s2 + $0xa0] sm:$0xff]  ;;  %v1699_v53 = vld [vmem:[%s3029_s2 + $0xa8] sm:$0xff]  ;;  %v1700_v55 = vld [vmem:[%s3029_s2 + $0xb0] sm:$0xff] }
  0x1f   :  { %1935 = vmatprep.mubr.msk.f32.mxu0 %vm99_vm0, %v2619_v16  ;;  %2223 = vmatpush3.bf16.msra.mxu0 %v2180_v3  ;;  %v2236_v54 = vpack.c.bf16 %v1699_v53, %v1698_v52  ;;  %v1701_v56 = vld [vmem:[%s3029_s2 + $0xb8] sm:$0xff]  ;;  %v69_v58 = vld [vmem:[%s3033_s6 + $0x80] sm:$0xff]  ;;  %v70_v59 = vld [vmem:[%s3033_s6 + $0x88] sm:$0xff] }
  0x20   :  { %2225 = vmatprep.subr.bf16.mxu0 %v2184_v6  ;;  %v2240_v57 = vpack.c.bf16 %v1701_v56, %v1700_v55  ;;  %v2733_v60 = vpack.c.bf16 %v70_v59, %v69_v58  ;;  %v53_v61 = vld [vmem:[%s3033_s6] sm:$0xff]  ;;  %v54_v62 = vld [vmem:[%s3033_s6 + $0x8] sm:$0xff]  ;;  %v71_v63 = vld [vmem:[%s3033_s6 + $0x90] sm:$0xff] }
  0x21   :  { %2199 = vmatpush3.bf16.msra.mxu1 %v2196_v17  ;;  %v55_v3 = vld [vmem:[%s3033_s6 + $0x10] sm:$0xff]  ;;  %v73_v7 = vld [vmem:[%s3033_s6 + $0xa0] sm:$0xff]  ;;  %v74_v8 = vld [vmem:[%s3033_s6 + $0xa8] sm:$0xff] }
  0x22   :  { %1936 = vmatmul.mubr.msk.f32.gmra.mrb[2].mxu0 %vm99_vm0, %v2634_v20  ;;  %2201 = vmatprep.subr.bf16.mxu1 %v2200_v22  ;;  %v2772_v9 = vpack.c.bf16 %v74_v8, %v73_v7  ;;  %v57_v10 = vld [vmem:[%s3033_s6 + $0x20] sm:$0xff]  ;;  %v58_v11 = vld [vmem:[%s3033_s6 + $0x28] sm:$0xff]  ;;  %v75_v13 = vld [vmem:[%s3033_s6 + $0xb0] sm:$0xff] }
  0x23   :  { %2227 = vmatpush3.bf16.msra.mxu0 %v2184_v6  ;;  %1990 = vmatprep.mubr.msk.f32.mxu0 %vm99_vm0, %v2639_v21  ;;  %v2780_v12 = vpack.c.bf16 %v58_v11, %v57_v10  ;;  %v76_v14 = vld [vmem:[%s3033_s6 + $0xb8] sm:$0xff]  ;;  %v59_v18 = vld [vmem:[%s3033_s6 + $0x30] sm:$0xff]  ;;  %v77_v26 = vld [vmem:[%s3033_s6 + $0xc0] sm:$0xff] }
  0x24   :  { %v2790_v17 = vpack.c.bf16 %v76_v14, %v75_v13  ;;  %v60_v19 = vld [vmem:[%s3033_s6 + $0x38] sm:$0xff]  ;;  %v78_v27 = vld [vmem:[%s3033_s6 + $0xc8] sm:$0xff]  ;;  %v61_v29 = vld [vmem:[%s3033_s6 + $0x40] sm:$0xff] }
  0x25   :  { %2203 = vmatpush3.bf16.msra.mxu1 %v2200_v22  ;;  %v2798_v22 = vpack.c.bf16 %v60_v19, %v59_v18  ;;  %v62_v30 = vld [vmem:[%s3033_s6 + $0x48] sm:$0xff]  ;;  %v63_v35 = vld [vmem:[%s3033_s6 + $0x50] sm:$0xff]  ;;  %v84_v45 = vld [vmem:[%s3033_s6 + $0xf8] sm:$0xff] }
  0x26   :  { %1991 = vmatmul.mubr.msk.f32.vlgmr.msra.gmra.mrb[4].mxu0 %vm99_vm0, %v2648_v23  ;;  %2205 = vmatprep.subr.bf16.mxu1 %v2204_v28  ;;  %v82_v39 = vld [vmem:[%s3033_s6 + $0xe8] sm:$0xff]  ;;  %v83_v44 = vld [vmem:[%s3033_s6 + $0xf0] sm:$0xff] }
  0x27   :  { %1993 = vmatprep.mubr.msk.f32.mxu0 %vm99_vm0, %v2653_v24 }
  0x2a   :  { %1994 = vmatmul.mubr.msk.f32.gmra.mrb[6].mxu0 %vm99_vm0, %v2662_v25 }
  0xf1   :  { %v1934_v31 = vpop.f32.mrb[0].mxu0 }
  0xf2   :  { %v178_v32 = vpop.f32.mrb[1].mxu0 }
  0xf3   :  { %1954 = vmatprep.mubr.msk.f32.mxu1 %vm205_vm1, %v178_v32  ;;  %v79_v32 = vld [vmem:[%s3033_s6 + $0xd0] sm:$0xff] }
  0xf4   :  { %1955 = vmatmul.mubr.msk.f32.vlgmr.msra.gmra.mrb[0].mxu1 %vm205_vm1, %v1934_v31  ;;  %v2816_v31 = vpack.c.bf16 %v62_v30, %v61_v29 }
  0xf5   :  { %2207 = vmatpush3.bf16.msra.mxu1 %v2204_v28  ;;  %v1937_v36 = vpop.f32.mrb[2].mxu0  ;;  %v2808_v28 = vpack.c.bf16 %v78_v27, %v77_v26 }
  0xf6   :  { %2209 = vmatprep.subr.bf16.mxu1 %v2208_v33  ;;  %v188_v38 = vpop.f32.mrb[3].mxu0 }
  0xf7   :  { %1957 = vmatprep.mubr.msk.f32.mxu1 %vm205_vm1, %v188_v38  ;;  %v81_v38 = vld [vmem:[%s3033_s6 + $0xe0] sm:$0xff] }
  0xf8   :  { %1958 = vmatmul.mubr.msk.f32.gmra.mrb[2].mxu1 %vm205_vm1, %v1937_v36  ;;  %v64_v36 = vld [vmem:[%s3033_s6 + $0x58] sm:$0xff]  ;;  %v2844_v40 = vpack.c.bf16 %v82_v39, %v81_v38  ;;  %v2904_v38 = vld [vmem:[%s3034_s7] sm:$0xff]  ;;  %v2498_v39 = vmov 0.0   ;;  %s2500_s7 = smov 120  }
  0xf9   :  { %2211 = vmatpush3.bf16.msra.mxu1 %v2208_v33  ;;  %1976 = vmatprep.mubr.msk.f32.mxu1 %vm205_vm1, %v2565_v0  ;;  %v1992_v41 = vpop.f32.mrb[4].mxu0  ;;  %v72_v0 = vld [vmem:[%s3033_s6 + $0x98] sm:$0xff] }
  0xfa   :  { %2213 = vmatprep.subr.bf16.mxu1 %v2212_v37  ;;  %v478_v43 = vpop.f32.mrb[5].mxu0  ;;  %v80_v33 = vld [vmem:[%s3033_s6 + $0xd8] sm:$0xff]  ;;  %2018 = vmatprep.subr.mxu0 %v2498_v39 }
  0xfb   :  { %v2826_v34 = vpack.c.bf16 %v80_v33, %v79_v32  ;;  %2020 = vmatprep.mubr.msk.f32.mxu0 %vm2499_vm2, %v2498_v39  ;;  %2019 = vmatpush3.msra.mxu0 %v2904_v38 }
  0xfc   :  { %2023 = vmatprep.subr.mxu0 %v2498_v39 }
  0xfd   :  { %2215 = vmatpush3.bf16.msra.mxu1 %v2212_v37  ;;  %v1995_v46 = vpop.f32.mrb[6].mxu0  ;;  %v2834_v37 = vpack.c.bf16 %v64_v36, %v63_v35  ;;  %v708_v36 = vld [vmem:[%s3031_s4] sm:$0x1] }
  0xfe   :  { %2217 = vmatprep.subr.bf16.mxu1 %v2216_v42  ;;  %v488_v48 = vpop.f32.mrb[7].mxu0 }
 0x101   :  { %2219 = vmatpush3.bf16.msra.mxu1 %v2216_v42  ;;  %v66_v42 = vld [vmem:[%s3033_s6 + $0x68] sm:$0xff] }
 0x102   :  { %2229 = vmatprep.subr.bf16.mxu1 %v2228_v47 }
 0x104   :  { %1977 = vmatmul.mubr.msk.f32.vlgmr.msra.gmra.mrb[0].mxu1 %vm205_vm1, %v2570_v1  ;;  %v2747_v1 = vpack.c.bf16 %v54_v62, %v53_v61 }
 0x105   :  { %2231 = vmatpush3.bf16.msra.mxu1 %v2228_v47  ;;  %1979 = vmatprep.mubr.msk.f32.mxu1 %vm205_vm1, %v2575_v2  ;;  %v2750_v2 = vpack.c.bf16 %v72_v0, %v71_v63  ;;  %v67_v47 = vld [vmem:[%s3033_s6 + $0x70] sm:$0xff] }
 0x106   :  { %2233 = vmatprep.subr.bf16.mxu1 %v2232_v51 }
 0x108   :  { %1980 = vmatmul.mubr.msk.f32.gmra.mrb[2].mxu1 %vm205_vm1, %v2582_v4  ;;  %v56_v4 = vld [vmem:[%s3033_s6 + $0x18] sm:$0xff] }
 0x109   :  { %2235 = vmatpush3.bf16.msra.mxu1 %v2232_v51  ;;  %2012 = vmatprep.mubr.msk.f32.mxu1 %vm205_vm1, %v478_v43  ;;  %v2761_v6 = vpack.c.bf16 %v56_v4, %v55_v3 }
 0x10a   :  { %2237 = vmatprep.subr.bf16.mxu1 %v2236_v54 }
 0x10d   :  { %2239 = vmatpush3.bf16.msra.mxu1 %v2236_v54 }
 0x10e   :  { %2241 = vmatprep.subr.bf16.mxu1 %v2240_v57 }
 0x111   :  { %2243 = vmatpush3.bf16.msra.mxu1 %v2240_v57 }
 0x112   :  { %2245 = vmatprep.subr.bf16.mxu1 %v2733_v60 }
 0x114   :  { %2013 = vmatmul.mubr.msk.f32.vlgmr.msra.gmra.mrb[0].mxu1 %vm205_vm1, %v1992_v41  ;;  %v65_v41 = vld [vmem:[%s3033_s6 + $0x60] sm:$0xff] }
 0x115   :  { %2015 = vmatprep.mubr.msk.f32.mxu1 %vm205_vm1, %v488_v48  ;;  %2247 = vmatpush3.bf16.msra.mxu1 %v2747_v1  ;;  %v2852_v43 = vpack.c.bf16 %v66_v42, %v65_v41  ;;  %v68_v48 = vld [vmem:[%s3033_s6 + $0x78] sm:$0xff] }
 0x116   :  { %2249 = vmatprep.subr.bf16.mxu1 %v2750_v2  ;;  %v2870_v49 = vpack.c.bf16 %v68_v48, %v67_v47  ;;  %v714_v48 = vld [vmem:[%s3031_s4 + $0x1] sm:$0x1] }
 0x118   :  { %2016 = vmatmul.mubr.msk.f32.gmra.mrb[2].mxu1 %vm205_vm1, %v1995_v46  ;;  %v2862_v46 = vpack.c.bf16 %v84_v45, %v83_v44 }
 0x119   :  { %2251 = vmatpush3.bf16.msra.mxu1 %v2761_v6 }
 0x11a   :  { %2253 = vmatprep.subr.bf16.mxu1 %v2772_v9 }
 0x11d   :  { %2255 = vmatpush3.bf16.msra.mxu1 %v2780_v12 }
 0x11e   :  { %2257 = vmatprep.subr.bf16.mxu1 %v2790_v17 }
 0x121   :  { %2259 = vmatpush3.bf16.msra.mxu1 %v2798_v22 }
 0x122   :  { %2261 = vmatprep.subr.bf16.mxu1 %v2808_v28 }
 0x125   :  { %2263 = vmatpush3.bf16.msra.mxu1 %v2816_v31 }
 0x126   :  { %2265 = vmatprep.subr.bf16.mxu1 %v2826_v34 }
 0x129   :  { %2267 = vmatpush3.bf16.msra.mxu1 %v2834_v37 }
 0x12a   :  { %2269 = vmatprep.subr.bf16.mxu1 %v2844_v40 }
 0x12d   :  { %2271 = vmatpush3.bf16.msra.mxu1 %v2852_v43 }
 0x12e   :  { %2273 = vmatprep.subr.bf16.mxu1 %v2862_v46 }
 0x131   :  { %2275 = vmatpush3.bf16.msra.mxu1 %v2870_v49 }
 0x1e7   :  { %v2874_v50 = vpop.f32.mrb[0].mxu1 }
 0x1e8   :  { %v608_v51 = vmul.f32 %v2874_v50, %v2874_v50  ;;  %v2878_v52 = vpop.f32.mrb[1].mxu1 }
 0x1e9   :  { %v607_v53 = vmul.f32 %v2878_v52, %v2878_v52  ;;  %v611_v54 = vadd.f32 %v2874_v50, %v2878_v52 }
 0x1eb   :  { %v620_v55 = vadd.f32 %v608_v51, %v607_v53  ;;  %v2884_v56 = vpop.f32.mrb[2].mxu1 }
 0x1ec   :  { %v2886_v57 = vpop.f32.mrb[3].mxu1  ;;  %v610_v61 = vmul.f32 %v2884_v56, %v2884_v56 }
 0x1ed   :  { %v609_v58 = vmul.f32 %v2886_v57, %v2886_v57  ;;  %v612_v59 = vadd.f32 %v611_v54, %v2886_v57 }
 0x1ef   :  { %v613_v62 = vadd.f32 %v2884_v56, %v612_v59  ;;  %v621_v63 = vadd.f32 %v620_v55, %v609_v58  ;;  %v989_v55 = vld [vmem:[#allocation2] sm:$0xff]  ;;  %v990_v58 = vld [vmem:[#allocation2 + $0x8] sm:$0xff]  ;;  %v991_v59 = vld [vmem:[#allocation2 + $0x10] sm:$0xff] }
 0x1f1   :  { %v614_v0 = vrot.slane %v613_v62, 4  ;;  %v622_v3 = vadd.f32 %v621_v63, %v610_v61  ;;  %v2284_v61 = vpack.c.bf16 %v990_v58, %v989_v55 }
 0x1f3   :  { %v615_v4 = vadd.f32 %v614_v0, %v613_v62  ;;  %v623_v7 = vrot.slane %v622_v3, 4  ;;  %v992_v62 = vld [vmem:[#allocation2 + $0x18] sm:$0xff]  ;;  %v993_v0 = vld [vmem:[#allocation2 + $0x20] sm:$0xff] }
 0x1f4   :  { %v2288_v63 = vpack.c.bf16 %v992_v62, %v991_v59 }
 0x1f5   :  { %v616_v8 = vrot.slane %v615_v4, 2  ;;  %v624_v10 = vadd.f32 %v623_v7, %v622_v3  ;;  %v994_v3 = vld [vmem:[#allocation2 + $0x28] sm:$0xff]  ;;  %v995_v7 = vld [vmem:[#allocation2 + $0x30] sm:$0xff] }
 0x1f7   :  { %v617_v11 = vadd.f32 %v616_v8, %v615_v4  ;;  %v625_v13 = vrot.slane %v624_v10, 2  ;;  %v2292_v4 = vpack.c.bf16 %v994_v3, %v993_v0  ;;  %v996_v8 = vld [vmem:[#allocation2 + $0x38] sm:$0xff] }
 0x1f9   :  { %v626_v14 = vadd.f32 %v625_v13, %v624_v10  ;;  %v618_v18 = vrot.slane %v617_v11, 1  ;;  %v2296_v10 = vpack.c.bf16 %v996_v8, %v995_v7  ;;  %v998_v13 = vld [vmem:[#allocation2 + $0x48] sm:$0xff]  ;;  %v899_v7 = vld [vmem:[#allocation2 + $0xd8] sm:$0xff] }
 0x1fb   :  { %v627_v19 = vrot.slane %v626_v14, 1  ;;  %v619_v27 = vadd.f32 %v618_v18, %v617_v11  ;;  %v997_v11 = vld [vmem:[#allocation2 + $0x40] sm:$0xff]  ;;  %v999_v18 = vld [vmem:[#allocation2 + $0x50] sm:$0xff] }
 0x1fd   :  { %v628_v26 = vadd.f32 %v627_v19, %v626_v14  ;;  %v2300_v14 = vpack.c.bf16 %v998_v13, %v997_v11  ;;  %v1000_v19 = vld [vmem:[#allocation2 + $0x58] sm:$0xff]  ;;  %v901_v11 = vld [vmem:[#allocation2 + $0xe8] sm:$0xff] }
 0x1ff   :  { %693 = vmatprep.mubr.f32.mxu1 %v628_v26  ;;  %v2304_v26 = vpack.c.bf16 %v1000_v19, %v999_v18  ;;  %v903_v18 = vld [vmem:[#allocation2 + $0xf8] sm:$0xff] }
 0x200   :  { %694 = vmatmul.mubr.f32.vlgmr.msra.gmra.mrb[4].mxu1 %v619_v27  ;;  %v1001_v27 = vld [vmem:[#allocation2 + $0x60] sm:$0xff] }
 0x201   :  { %2036 = vmatprep.mubr.msk.f32.mxu1 %vm99_vm0, %v2587_v5 }
 0x2d3   :  { %v1802_v29 = vpop.f32.mrb[4].mxu1 }
 0x2d4   :  { %v1803_v30 = vpop.f32.mrb[5].mxu1 }
 0x2d5   :  { %v1804_v32 = vadd.f32 %v1803_v30, %v1802_v29  ;;  %v1002_v29 = vld [vmem:[#allocation2 + $0x68] sm:$0xff] }
 0x2d6   :  { %v2308_v30 = vpack.c.bf16 %v1002_v29, %v1001_v27  ;;  %v1262_v27 = vld [vmem:[#allocation2 + $0x108] sm:$0xff] }
 0x2d7   :  { %v699_v33 = vmul.f32 0.001953125, %v1804_v32  ;;  %v1003_v32 = vld [vmem:[#allocation2 + $0x70] sm:$0xff] }
 0x2d9   :  { %v700_v35 = vmul.f32 %v699_v33, %v699_v33 }
 0x2db   :  { %702 = vrot.lane.b32.xlu0 %v700_v35, %s2497_s16 }
 0x2df   :  { %710 = vrot.lane.b32.xlu0 %v708_v36, %s2497_s16  ;;  %v867_v36 = vlaneseq }
 0x34d   :  { %v703_v5 = vpop.permute.xlu0 %702 }
 0x34e   :  { %v705_v41 = vsub.f32 %v699_v33, %v703_v5  ;;  %v868_v5 = vshrl.u32 %v867_v36, 7  ;;  %v1266_v36 = vld [vmem:[#allocation2 + $0x128] sm:$0xff] }
 0x350   :  { %v706_v42 = vadd.f32 1e-05, %v705_v41  ;;  %v2920_v41 = vsub.s32 0, %v868_v5 }
 0x351   :  { %v711_v44 = vpop.permute.xlu0 %710 }
 0x352   :  { %2443 = vrsqrt.f32 %v706_v42 }
 0x35c   :  { %v2444_v45 = vpop.eup %2443 }
 0x35d   :  { %v713_v47 = vmul.f32 %v2444_v45, %v711_v44 }
 0x35f   :  { %716 = vrot.lane.b32.xlu1 %v713_v47, %s2500_s7 }
 0x3d1   :  { %v717_v51 = vpop.permute.xlu1 %716 }
 0x3d2   :  { %v719_v53 = vmul.f32 %v717_v51, %v699_v33  ;;  %2021 = vmatmul.mubr.msk.f32.vlgmr.msra.gmra.mrb[8].mxu0 %vm721_vm3, %v717_v51  ;;  %v1004_v33 = vld [vmem:[#allocation2 + $0x78] sm:$0xff] }
 0x3d3   :  { %2024 = vmatpush3.msra.mxu0 %v2904_v38  ;;  %2025 = vmatprep.mubr.msk.f32.mxu0 %vm2499_vm2, %v2498_v39  ;;  %v2312_v35 = vpack.c.bf16 %v1004_v33, %v1003_v32  ;;  %v1264_v32 = vld [vmem:[#allocation2 + $0x118] sm:$0xff] }
 0x3d4   :  { %v720_v54 = vsub.f32 %v714_v48, %v719_v53  ;;  %2285 = vmatprep.subr.bf16.mxu0 %v2284_v61 }
 0x3d6   :  { %2026 = vmatmul.mubr.msk.f32.vlgmr.msra.gmra.mrb[10].mxu0 %vm721_vm3, %v720_v54 }
 0x3d7   :  { %2287 = vmatpush3.bf16.msra.mxu0 %v2284_v61 }
 0x3d8   :  { %2289 = vmatprep.subr.bf16.mxu0 %v2288_v63 }
 0x3db   :  { %2291 = vmatpush3.bf16.msra.mxu0 %v2288_v63 }
 0x3dc   :  { %2293 = vmatprep.subr.bf16.mxu0 %v2292_v4 }
 0x3df   :  { %2295 = vmatpush3.bf16.msra.mxu0 %v2292_v4  ;;  %v898_v4 = vld [vmem:[#allocation2 + $0xd0] sm:$0xff] }
 0x3e0   :  { %2297 = vmatprep.subr.bf16.mxu0 %v2296_v10  ;;  %v2336_v8 = vpack.c.bf16 %v899_v7, %v898_v4 }
 0x3e3   :  { %2299 = vmatpush3.bf16.msra.mxu0 %v2296_v10  ;;  %v900_v10 = vld [vmem:[#allocation2 + $0xe0] sm:$0xff] }
 0x3e4   :  { %2301 = vmatprep.subr.bf16.mxu0 %v2300_v14  ;;  %v2340_v13 = vpack.c.bf16 %v901_v11, %v900_v10 }
 0x3e7   :  { %2303 = vmatpush3.bf16.msra.mxu0 %v2300_v14  ;;  %v902_v14 = vld [vmem:[#allocation2 + $0xf0] sm:$0xff] }
 0x3e8   :  { %2305 = vmatprep.subr.bf16.mxu0 %v2304_v26  ;;  %v2344_v19 = vpack.c.bf16 %v903_v18, %v902_v14 }
 0x3eb   :  { %2307 = vmatpush3.bf16.msra.mxu0 %v2304_v26  ;;  %v1261_v26 = vld [vmem:[#allocation2 + $0x100] sm:$0xff] }
 0x3ec   :  { %2309 = vmatprep.subr.bf16.mxu0 %v2308_v30  ;;  %v2356_v29 = vpack.c.bf16 %v1262_v27, %v1261_v26 }
 0x3ef   :  { %2311 = vmatpush3.bf16.msra.mxu0 %v2308_v30  ;;  %v1263_v30 = vld [vmem:[#allocation2 + $0x110] sm:$0xff] }
 0x3f0   :  { %2313 = vmatprep.subr.bf16.mxu0 %v2312_v35  ;;  %v2360_v33 = vpack.c.bf16 %v1264_v32, %v1263_v30 }
 0x3f3   :  { %2315 = vmatpush3.bf16.msra.mxu0 %v2312_v35  ;;  %v1265_v35 = vld [vmem:[#allocation2 + $0x120] sm:$0xff] }
 0x3f4   :  { %v2364_v5 = vpack.c.bf16 %v1266_v36, %v1265_v35 }
 0x4a5   :  { %v790_v42 = vpop.f32.mrb[8].mxu0 }
 0x4a6   :  { %v870_v44 = vrot.slane %v790_v42, %v2920_v41  ;;  %v2022_v45 = vpop.f32.mrb[9].mxu0  ;;  %v1267_v42 = vld [vmem:[#allocation2 + $0x130] sm:$0xff] }
 0x4a8   :  { %v871_v47 = vmul.f32 %v870_v44, %v2878_v52  ;;  %v872_v48 = vmul.f32 %v2874_v50, %v870_v44  ;;  %v873_v51 = vmul.f32 %v870_v44, %v2886_v57  ;;  %v874_v53 = vmul.f32 %v2884_v56, %v870_v44  ;;  %v1268_v44 = vld [vmem:[#allocation2 + $0x138] sm:$0xff] }
 0x4a9   :  { %v863_v54 = vpop.f32.mrb[10].mxu0  ;;  %v2368_v45 = vpack.c.bf16 %v1268_v44, %v1267_v42 }
 0x4aa   :  { %v878_v55 = vrot.slane %v863_v54, %v2920_v41  ;;  %v2027_v58 = vpop.f32.mrb[11].mxu0  ;;  %v1272_v54 = vld [vmem:[#allocation2 + $0x158] sm:$0xff] }
 0x4ab   :  { %v1273_v58 = vld [vmem:[#allocation2 + $0x160] sm:$0xff] }
 0x4ac   :  { %v2928_v59 = vadd.f32 %v878_v55, %v871_v47  ;;  %v2930_v61 = vadd.f32 %v878_v55, %v872_v48  ;;  %v2932_v62 = vadd.f32 %v878_v55, %v873_v51  ;;  %v2934_v63 = vadd.f32 %v878_v55, %v874_v53  ;;  %v1269_v47 = vld [vmem:[#allocation2 + $0x140] sm:$0xff]  ;;  %v1270_v48 = vld [vmem:[#allocation2 + $0x148] sm:$0xff]  ;;  %v1271_v53 = vld [vmem:[#allocation2 + $0x150] sm:$0xff] }
 0x4ad   :  { %v2372_v51 = vpack.c.bf16 %v1270_v48, %v1269_v47  ;;  %v2376_v55 = vpack.c.bf16 %v1272_v54, %v1271_v53 }
 0x4ae   :  { %v883_v52 = vmax.f32 %v2928_v59, 0.0  ;;  %v884_v50 = vmax.f32 %v2930_v61, 0.0  ;;  %v885_v57 = vmax.f32 %v2932_v62, 0.0  ;;  %v886_v56 = vmax.f32 %v2934_v63, 0.0  ;;  %v1274_v59 = vld [vmem:[#allocation2 + $0x168] sm:$0xff]  ;;  %v1275_v62 = vld [vmem:[#allocation2 + $0x170] sm:$0xff] }
 0x4af   :  { %v2380_v61 = vpack.c.bf16 %v1274_v59, %v1273_v58  ;;  %v1276_v63 = vld [vmem:[#allocation2 + $0x178] sm:$0xff] }
 0x4b0   :  { %v2276_v0 = vpack.c.bf16 %v884_v50, %v883_v52  ;;  %v2280_v3 = vpack.c.bf16 %v886_v56, %v885_v57 }
 0x4b2   :  { %2277 = vmatprep.subr.bf16.mxu1 %v2276_v0 }
 0x4b3   :  { %2279 = vmatpush3.bf16.msra.mxu1 %v2276_v0 }
 0x4b4   :  { %2281 = vmatprep.subr.bf16.mxu1 %v2280_v3 }
 0x4b7   :  { %2283 = vmatpush3.bf16.msra.mxu1 %v2280_v3 }
 0x4b8   :  { %2349 = vmatprep.subr.bf16.mxu1 %v2276_v0 }
 0x4ba   :  { %2037 = vmatmul.mubr.msk.f32.vlgmr.msra.gmra.mrb[6].mxu1 %vm99_vm0, %v2614_v15  ;;  %v888_v15 = vld [vmem:[#allocation2 + $0x80] sm:$0xff] }
 0x4bb   :  { %2351 = vmatpush3.bf16.msra.mxu1 %v2276_v0  ;;  %2039 = vmatprep.mubr.msk.f32.mxu1 %vm99_vm0, %v2619_v16  ;;  %v889_v16 = vld [vmem:[#allocation2 + $0x88] sm:$0xff] }
 0x4bc   :  { %2353 = vmatprep.subr.bf16.mxu1 %v2280_v3 }
 0x4be   :  { %2040 = vmatmul.mubr.msk.f32.gmra.mrb[8].mxu1 %vm99_vm0, %v2634_v20  ;;  %v2316_v20 = vpack.c.bf16 %v889_v16, %v888_v15 }
 0x4bf   :  { %2355 = vmatpush3.bf16.msra.mxu1 %v2280_v3  ;;  %2126 = vmatprep.mubr.msk.f32.mxu1 %vm99_vm0, %v2639_v21  ;;  %v890_v21 = vld [vmem:[#allocation2 + $0x90] sm:$0xff] }
 0x4c0   :  { %2389 = vmatprep.subr.bf16.mxu1 %v2733_v60  ;;  %2317 = vmatprep.subr.bf16.mxu0 %v2316_v20 }
 0x4c2   :  { %2127 = vmatmul.mubr.msk.f32.vlgmr.msra.gmra.mrb[10].mxu1 %vm99_vm0, %v2648_v23  ;;  %v891_v23 = vld [vmem:[#allocation2 + $0x98] sm:$0xff] }
 0x4c3   :  { %2129 = vmatprep.mubr.msk.f32.mxu1 %vm99_vm0, %v2653_v24  ;;  %2391 = vmatpush3.bf16.msra.mxu1 %v2747_v1  ;;  %v2320_v60 = vpack.c.bf16 %v891_v23, %v890_v21  ;;  %v892_v1 = vld [vmem:[#allocation2 + $0xa0] sm:$0xff] }
 0x4c4   :  { %2393 = vmatprep.subr.bf16.mxu1 %v2750_v2  ;;  %v893_v2 = vld [vmem:[#allocation2 + $0xa8] sm:$0xff] }
 0x4c6   :  { %2130 = vmatmul.mubr.msk.f32.gmra.mrb[12].mxu1 %vm99_vm0, %v2662_v25 }
 0x4c7   :  { %2395 = vmatpush3.bf16.msra.mxu1 %v2761_v6 }
 0x4c8   :  { %2397 = vmatprep.subr.bf16.mxu1 %v2772_v9 }
 0x4cb   :  { %2399 = vmatpush3.bf16.msra.mxu1 %v2780_v12  ;;  %v2324_v12 = vpack.c.bf16 %v893_v2, %v892_v1 }
 0x4cc   :  { %2401 = vmatprep.subr.bf16.mxu1 %v2790_v17  ;;  %v894_v17 = vld [vmem:[#allocation2 + $0xb0] sm:$0xff] }
 0x4cf   :  { %2403 = vmatpush3.bf16.msra.mxu1 %v2798_v22  ;;  %v895_v22 = vld [vmem:[#allocation2 + $0xb8] sm:$0xff] }
 0x4d0   :  { %2405 = vmatprep.subr.bf16.mxu1 %v2808_v28 }
 0x4d3   :  { %2407 = vmatpush3.bf16.msra.mxu1 %v2816_v31  ;;  %v2328_v31 = vpack.c.bf16 %v895_v22, %v894_v17 }
 0x4d4   :  { %2409 = vmatprep.subr.bf16.mxu1 %v2826_v34 }
 0x4d7   :  { %2411 = vmatpush3.bf16.msra.mxu1 %v2834_v37  ;;  %v896_v37 = vld [vmem:[#allocation2 + $0xc0] sm:$0xff] }
 0x4d8   :  { %2413 = vmatprep.subr.bf16.mxu1 %v2844_v40  ;;  %v897_v40 = vld [vmem:[#allocation2 + $0xc8] sm:$0xff] }
 0x4db   :  { %2415 = vmatpush3.bf16.msra.mxu1 %v2852_v43 }
 0x4dc   :  { %2417 = vmatprep.subr.bf16.mxu1 %v2862_v46  ;;  %v2332_v46 = vpack.c.bf16 %v897_v40, %v896_v37 }
 0x4df   :  { %2419 = vmatpush3.bf16.msra.mxu1 %v2870_v49 }
 0x4e0   :  { %2175 = vmatprep.subr.mxu1 %v2498_v39 }
 0x58d   :  { %v2038_v24 = vpop.f32.mrb[6].mxu1 }
 0x58e   :  { %v970_v25 = vpop.f32.mrb[7].mxu1 }
 0x58f   :  { %2074 = vmatprep.mubr.f32.mxu0 %v970_v25 }
 0x590   :  { %2075 = vmatmul.mubr.f32.vlgmr.msra.gmra.mrb[12].mxu0 %v2038_v24 }
 0x591   :  { %2319 = vmatpush3.bf16.msra.mxu0 %v2316_v20  ;;  %v2041_v6 = vpop.f32.mrb[8].mxu1 }
 0x592   :  { %v980_v9 = vpop.f32.mrb[9].mxu1  ;;  %2321 = vmatprep.subr.bf16.mxu0 %v2320_v60 }
 0x593   :  { %2077 = vmatprep.mubr.f32.mxu0 %v980_v9 }
 0x594   :  { %2078 = vmatmul.mubr.f32.gmra.mrb[14].mxu0 %v2041_v6 }
 0x595   :  { %2323 = vmatpush3.bf16.msra.mxu0 %v2320_v60  ;;  %2112 = vmatprep.mubr.f32.mxu0 %v883_v52  ;;  %v2977_v28 = vpop.f32.mrb[10].mxu1  ;;  %v2384_v52 = vpack.c.bf16 %v1276_v63, %v1275_v62 }
 0x596   :  { %2325 = vmatprep.subr.bf16.mxu0 %v2324_v12  ;;  %v1241_v34 = vpop.f32.mrb[11].mxu1 }
 0x599   :  { %2327 = vmatpush3.bf16.msra.mxu0 %v2324_v12  ;;  %v2979_v43 = vpop.f32.mrb[12].mxu1 }
 0x59a   :  { %2329 = vmatprep.subr.bf16.mxu0 %v2328_v31  ;;  %v2981_v49 = vpop.f32.mrb[13].mxu1 }
 0x59d   :  { %2331 = vmatpush3.bf16.msra.mxu0 %v2328_v31 }
 0x59e   :  { %2333 = vmatprep.subr.bf16.mxu0 %v2332_v46 }
 0x5a1   :  { %2335 = vmatpush3.bf16.msra.mxu0 %v2332_v46  ;;  %v1467_v46 = vld [vmem:[%s3032_s5] sm:$0x1] }
 0x5a2   :  { %2337 = vmatprep.subr.bf16.mxu0 %v2336_v8  ;;  %1469 = vrot.lane.b32.xlu0 %v1467_v46, %s2497_s16 }
 0x5a5   :  { %2339 = vmatpush3.bf16.msra.mxu0 %v2336_v8 }
 0x5a6   :  { %2341 = vmatprep.subr.bf16.mxu0 %v2340_v13 }
 0x5a9   :  { %2343 = vmatpush3.bf16.msra.mxu0 %v2340_v13 }
 0x5aa   :  { %2345 = vmatprep.subr.bf16.mxu0 %v2344_v19 }
 0x5ad   :  { %2347 = vmatpush3.bf16.msra.mxu0 %v2344_v19  ;;  %v1473_v19 = vld [vmem:[%s3032_s5 + $0x1] sm:$0x1]  ;;  %s2501_s5 = smov [#allocation5]  }
 0x5ae   :  { %2357 = vmatprep.subr.bf16.mxu0 %v2356_v29  ;;  %s1654_s23 = sshll.u32 %s2501_s5, 4  ;;  %s1655_s23 = int_to_ptr.vmem [resolvable:$true] %s1654_s23 }
 0x5af   :  { %s2469_s24 = scalar_lea.vmem %s1655_s23, 512  ;;  %p2474_p9 = scmp.lt.s32.totalorder %s1655_s23, %s1655_s23 }
 0x5b0   :  { %2113 = vmatmul.mubr.f32.vlgmr.msra.gmra.mrb[12].mxu0 %v884_v50  ;;  %p2470_p8 = scmp.ne.s32.totalorder %s1655_s23, %s2469_s24  ;;  %p2475_p10 = scmp.lt.s32.totalorder %s2469_s24, %s2469_s24 }
 0x5b1   :  { %2115 = vmatprep.mubr.f32.mxu0 %v885_v57  ;;  %2359 = vmatpush3.bf16.msra.mxu0 %v2356_v29 }
 0x5b2   :  { %2361 = vmatprep.subr.bf16.mxu0 %v2360_v33  ;;  %p2476_p11 = por %p2475_p10, %p2474_p9 }
 0x5b4   :  { %2116 = vmatmul.mubr.f32.gmra.mrb[14].mxu0 %v886_v56  ;;  %p2477_p12 = pnand %p2476_p11, %p2470_p8 }
 0x5b5   :  { %2363 = vmatpush3.bf16.msra.mxu0 %v2360_v33  ;;  %2164 = vmatprep.mubr.f32.mxu0 %v1241_v34 }
 0x5b6   :  { %2365 = vmatprep.subr.bf16.mxu0 %v2364_v5 }
 0x5b9   :  { %2367 = vmatpush3.bf16.msra.mxu0 %v2364_v5 }
 0x5ba   :  { %2369 = vmatprep.subr.bf16.mxu0 %v2368_v45 }
 0x5bd   :  { %2371 = vmatpush3.bf16.msra.mxu0 %v2368_v45 }
 0x5be   :  { %2373 = vmatprep.subr.bf16.mxu0 %v2372_v51 }
 0x5c1   :  { %2375 = vmatpush3.bf16.msra.mxu0 %v2372_v51 }
 0x5c2   :  { %2377 = vmatprep.subr.bf16.mxu0 %v2376_v55 }
 0x5c5   :  { %2379 = vmatpush3.bf16.msra.mxu0 %v2376_v55 }
 0x5c6   :  { %2381 = vmatprep.subr.bf16.mxu0 %v2380_v61 }
 0x5c9   :  { %2383 = vmatpush3.bf16.msra.mxu0 %v2380_v61 }
 0x5ca   :  { %2385 = vmatprep.subr.bf16.mxu0 %v2384_v52 }
 0x5cd   :  { %2387 = vmatpush3.bf16.msra.mxu0 %v2384_v52 }
 0x5ce   :  { %2170 = vmatprep.subr.mxu0 %v2498_v39 }
 0x5d0   :  { %2165 = vmatmul.mubr.f32.vlgmr.msra.gmra.mrb[12].mxu0 %v2977_v28 }
 0x5d1   :  { %2167 = vmatprep.mubr.f32.mxu0 %v2981_v49  ;;  %2171 = vmatpush3.msra.mxu0 %v2904_v38 }
 0x5d4   :  { %2168 = vmatmul.mubr.f32.gmra.mrb[14].mxu0 %v2979_v43 }
 0x5d5   :  { %2172 = vmatprep.mubr.msk.f32.mxu0 %vm2499_vm2, %v2498_v39 }
 0x6a3   :  { %v2166_v50 = vpop.f32.mrb[12].mxu0 }
 0x6a4   :  { %v1367_v57 = vmul.f32 %v2166_v50, %v2166_v50  ;;  %v1343_v56 = vpop.f32.mrb[13].mxu0 }
 0x6a5   :  { %v1366_v0 = vmul.f32 %v1343_v56, %v1343_v56  ;;  %v1370_v3 = vadd.f32 %v2166_v50, %v1343_v56 }
 0x6a7   :  { %v1379_v15 = vadd.f32 %v1367_v57, %v1366_v0  ;;  %v2169_v16 = vpop.f32.mrb[14].mxu0 }
 0x6a8   :  { %v1353_v20 = vpop.f32.mrb[15].mxu0  ;;  %v1369_v24 = vmul.f32 %v2169_v16, %v2169_v16 }
 0x6a9   :  { %v1368_v21 = vmul.f32 %v1353_v20, %v1353_v20  ;;  %v1371_v23 = vadd.f32 %v1370_v3, %v1353_v20 }
 0x6ab   :  { %v1372_v25 = vadd.f32 %v2169_v16, %v1371_v23  ;;  %v1380_v60 = vadd.f32 %v1379_v15, %v1368_v21 }
 0x6ad   :  { %v1373_v1 = vrot.slane %v1372_v25, 4  ;;  %v1381_v2 = vadd.f32 %v1380_v60, %v1369_v24 }
 0x6af   :  { %v1374_v6 = vadd.f32 %v1373_v1, %v1372_v25  ;;  %v1382_v9 = vrot.slane %v1381_v2, 4 }
 0x6b1   :  { %v1375_v12 = vrot.slane %v1374_v6, 2  ;;  %v1383_v17 = vadd.f32 %v1382_v9, %v1381_v2 }
 0x6b3   :  { %v1376_v22 = vadd.f32 %v1375_v12, %v1374_v6  ;;  %v1384_v28 = vrot.slane %v1383_v17, 2 }
 0x6b5   :  { %v1385_v31 = vadd.f32 %v1384_v28, %v1383_v17  ;;  %v1377_v34 = vrot.slane %v1376_v22, 1 }
 0x6b7   :  { %v1386_v37 = vrot.slane %v1385_v31, 1  ;;  %v1378_v43 = vadd.f32 %v1377_v34, %v1376_v22 }
 0x6b9   :  { %v1387_v40 = vadd.f32 %v1386_v37, %v1385_v31 }
 0x6bb   :  { %1452 = vmatprep.mubr.f32.mxu1 %v1387_v40 }
 0x6bc   :  { %1453 = vmatmul.mubr.f32.vlgmr.msra.gmra.mrb[14].mxu1 %v1378_v43 }
 0x6bd   :  { %2176 = vmatpush3.msra.mxu1 %v2904_v38  ;;  %2177 = vmatprep.mubr.msk.f32.mxu1 %vm2499_vm2, %v2498_v39  ;;  %v1470_v38 = vpop.permute.xlu0 %1469 }
 0x78f   :  { %v1917_v49 = vpop.f32.mrb[14].mxu1 }
 0x790   :  { %v1918_v4 = vpop.f32.mrb[15].mxu1 }
 0x791   :  { %v1919_v7 = vadd.f32 %v1918_v4, %v1917_v49 }
 0x793   :  { %v1458_v8 = vmul.f32 0.001953125, %v1919_v7 }
 0x795   :  { %v1459_v10 = vmul.f32 %v1458_v8, %v1458_v8 }
 0x797   :  { %1461 = vrot.lane.b32.xlu1 %v1459_v10, %s2497_s16 }
 0x809   :  { %v1462_v11 = vpop.permute.xlu1 %1461 }
 0x80a   :  { %v1464_v13 = vsub.f32 %v1458_v8, %v1462_v11 }
 0x80c   :  { %v1465_v14 = vadd.f32 1e-05, %v1464_v13 }
 0x80e   :  { %2445 = vrsqrt.f32 %v1465_v14 }
 0x818   :  { %v2446_v18 = vpop.eup %2445 }
 0x819   :  { %v1472_v39 = vmul.f32 %v2446_v18, %v1470_v38 }
 0x81b   :  { %1475 = vrot.lane.b32.xlu1 %v1472_v39, %s2500_s7 }
 0x88d   :  { %v1476_v26 = vpop.permute.xlu1 %1475 }
 0x88e   :  { %v1478_v27 = vmul.f32 %v1476_v26, %v1458_v8  ;;  %2173 = vmatmul.mubr.msk.f32.vlgmr.msra.gmra.mrb[16].mxu0 %vm721_vm3, %v1476_v26 }
 0x890   :  { %v1479_v29 = vsub.f32 %v1473_v19, %v1478_v27 }
 0x892   :  { %2178 = vmatmul.mubr.msk.f32.vlgmr.msra.gmra.mrb[16].mxu1 %vm721_vm3, %v1479_v29 }
 0x961   :  { %v1548_v30 = vpop.f32.mrb[16].mxu0 }
 0x962   :  { %v1628_v32 = vrot.slane %v1548_v30, %v2920_v41  ;;  %v2174_v33 = vpop.f32.mrb[17].mxu0 }
 0x964   :  { %v1629_v35 = vmul.f32 %v1628_v32, %v1343_v56  ;;  %v1630_v36 = vmul.f32 %v2166_v50, %v1628_v32  ;;  %v1631_v5 = vmul.f32 %v1628_v32, %v1353_v20  ;;  %v1632_v42 = vmul.f32 %v2169_v16, %v1628_v32 }
 0x965   :  { %v1621_v44 = vpop.f32.mrb[16].mxu1 }
 0x966   :  { %v1636_v45 = vrot.slane %v1621_v44, %v2920_v41  ;;  %v2179_v47 = vpop.f32.mrb[17].mxu1 }
 0x968   :  { %v1637_v48 = vadd.f32 %v1636_v45, %v1629_v35  ;;  %v1638_v51 = vadd.f32 %v1636_v45, %v1630_v36  ;;  %v1639_v53 = vadd.f32 %v1636_v45, %v1631_v5  ;;  %v1640_v54 = vadd.f32 %v1636_v45, %v1632_v42 }
 0x96a   :  { %v1641_v55 = vmax.f32 %v1637_v48, 0.0  ;;  %v1642_v58 = vmax.f32 %v1638_v51, 0.0  ;;  %v1643_v59 = vmax.f32 %v1639_v53, 0.0  ;;  %v1644_v61 = vmax.f32 %v1640_v54, 0.0 }
 0x96c   :  { %1645 = vst [vmem:[#allocation5] sm:$0xff] %v1641_v55  ;;  %1646 = vst [vmem:[#allocation5 + $0x8] sm:$0xff] %v1642_v58 }
 0x96d   :  { %1647 = vst [vmem:[#allocation5 + $0x10] sm:$0xff] %v1643_v59  ;;  %1648 = vst [vmem:[#allocation5 + $0x18] sm:$0xff] %v1644_v61 }
 0x96e   :  { %2480 = shalt.err (!%p2477_p12)
}
 0x96f   :  { %s2481_s2 = scalar_lea.hbm %s3035_s8, 512 }
 0x970   :  { %p2482_p13 = scmp.ne.s32.totalorder %s3035_s8, %s2481_s2  ;;  %p2485_p0 = scmp.lt.u32.totalorder %s2481_s2, %s3035_s8 }
 0x972   :  { %p2487_p1 = pnand %p2485_p0, %p2482_p13 }
 0x974   :  { %2490 = shalt.err (!%p2487_p1)
}
 0x975   :  { %1660 = dma.vmem_to_hbm [thread:$0]  %s1655_s23, 512, %s3035_s8, [#allocation4], %s2496_s15, %s2496_s15, %s2497_s16  }
 0x976   :  { %2493 = dma.done.wait [#allocation4], 512  }
 0x977   :  { %2494 = vsyncadd [#allocation4], 4294966784 }
 0x978   :  { %1664 = vsyncpa [#allocation3], 1 }
 0x979   :  { %1665 = vsyncpa [#allocation4], 1 }

</bundles_post_ra>
